<compile_context>
chip_gen: v5e
topology: v5e:2x2
jax: 0.10.0
libtpu: 0.0.40
codegen_flags: <defaults>
</compile_context>

<pallas_src>
import jax
import jax.numpy as jnp
from jax.experimental import pallas as pl
from jax.experimental.pallas import tpu as pltpu

# The PyTorch module references undefined module-level constants; pick small,
# consistent values here (synthetic kernel, deterministic init).
N_FEATURES = 1
N_HIDDEN = 32
SEQ_LENGTH = 8
N_LAYERS = 1


def _full_spec(shape):
    n = len(shape)
    return pl.BlockSpec(shape, lambda *_, n=n: (0,) * n)


# --------------------------------------------------------------------------
# Fused kernel: all LSTM layers + view(seq_len, n, H)[-1] + Linear head.
# --------------------------------------------------------------------------
def _make_kernel(T, B, H, n_seq, n_layers):
    TB = T * B

    def kernel(*refs):
        x_ref = refs[0]                                   # (T*B, F) time-major, rows flattened
        layer_refs = refs[1 : 1 + 3 * n_layers]           # (w_ih_t, w_hh_t, b) per layer
        w_lin_ref = refs[1 + 3 * n_layers]                 # (1, H)
        b_lin_ref = refs[2 + 3 * n_layers]                 # (1, 1)
        o_ref = refs[3 + 3 * n_layers]                     # (n_seq, 1) output
        hist_ref = refs[4 + 3 * n_layers]                  # (T*B, H)  VMEM h history
        gx_ref = refs[5 + 3 * n_layers]                    # (T*B, 4H) VMEM hoisted projections

        for l in range(n_layers):
            w_ih_t_ref, w_hh_t_ref, b_ref = layer_refs[3 * l : 3 * l + 3]
            f_in = w_ih_t_ref.shape[0]

            # ---- hoisted (non-recurrent) input projection for ALL time steps ----
            inp = x_ref[...] if l == 0 else hist_ref[...]             # (T*B, F_l)
            if f_in == 1:
                gx = inp * w_ih_t_ref[...]        # F==1: VPU broadcast outer product
            else:
                gx = jnp.dot(inp, w_ih_t_ref[...],
                             preferred_element_type=jnp.float32)
            gx_ref[...] = gx + b_ref[...]                              # (T*B, 4H)

            w_hh_t = w_hh_t_ref[...]                                   # (H, 4H), loaded once

            # ---- serial recurrence: only h @ W_hh^T on the chain, static offsets ----
            h = jnp.zeros((B, H), jnp.float32)                         # reset_hidden_state()
            c = jnp.zeros((B, H), jnp.float32)
            for t in range(T):                                         # T static & tiny
                r0 = t * B                                             # static -> free view
                gates = gx_ref[pl.ds(r0, B), :] + jnp.dot(
                    h, w_hh_t, preferred_element_type=jnp.float32)     # (B, 4H) = 1 vreg
                # gate layout after prep-time permutation: [ i | f | o | g ]
                sig = jax.nn.sigmoid(gates[:, : 3 * H])                # i,f,o : one EUP push
                g = jnp.tanh(gates[:, 3 * H :])                        # g     : one EUP push
                c = sig[:, H : 2 * H] * c + sig[:, :H] * g
                h = sig[:, 2 * H : 3 * H] * jnp.tanh(c)
                hist_ref[pl.ds(r0, B), :] = h                          # VMEM only, never HBM

        # ---- fused epilogue: lstm_out.view(SEQ_LENGTH, n_seq, H)[-1] + Linear(H -> 1) ----
        # The view/[-1] selects the last n_seq rows of the row-major (T*B, H) flattening.
        last = hist_ref[pl.ds(TB - n_seq, n_seq), :]                   # (n_seq, H), static view
        # N=1 linear head as VPU multiply + lane reduction (no masked N=1 MXU matmul).
        y = jnp.sum(last * w_lin_ref[...], axis=-1, keepdims=True) + b_lin_ref[...]
        o_ref[...] = y                                                 # (n_seq, 1)

    return kernel


# --------------------------------------------------------------------------
# Parameters: raw PyTorch layout + one-time prep (transpose / permute / fold).
# --------------------------------------------------------------------------
def init_params(key):
    """Raw parameters in PyTorch layout (nn.LSTM / nn.Linear default uniform init)."""
    params = {}
    bound = 1.0 / float(N_HIDDEN) ** 0.5
    in_size = N_FEATURES
    for l in range(N_LAYERS):
        key, k1, k2, k3, k4 = jax.random.split(key, 5)
        params[f"lstm_{l}"] = (
            jax.random.uniform(k1, (4 * N_HIDDEN, in_size), jnp.float32, -bound, bound),
            jax.random.uniform(k2, (4 * N_HIDDEN, N_HIDDEN), jnp.float32, -bound, bound),
            jax.random.uniform(k3, (4 * N_HIDDEN,), jnp.float32, -bound, bound),
            jax.random.uniform(k4, (4 * N_HIDDEN,), jnp.float32, -bound, bound),
        )
        in_size = N_HIDDEN
    key, k1, k2 = jax.random.split(key, 3)
    params["linear"] = (
        jax.random.uniform(k1, (1, N_HIDDEN), jnp.float32, -bound, bound),
        jax.random.uniform(k2, (1,), jnp.float32, -bound, bound),
    )
    return params


def prepare_params(params):
    """One-time prep: transpose weights, fold b_ih+b_hh, permute gates i,f,g,o -> i,f,o,g."""
    H = N_HIDDEN
    perm = jnp.concatenate([
        jnp.arange(0, 2 * H),        # i, f
        jnp.arange(3 * H, 4 * H),    # o
        jnp.arange(2 * H, 3 * H),    # g
    ])
    prepared = {}
    for l in range(N_LAYERS):
        w_ih, w_hh, b_ih, b_hh = params[f"lstm_{l}"]
        prepared[f"lstm_{l}"] = (
            jnp.transpose(w_ih)[:, perm].astype(jnp.float32),           # (F, 4H)
            jnp.transpose(w_hh)[:, perm].astype(jnp.float32),           # (H, 4H)
            (b_ih + b_hh)[perm].reshape(1, 4 * H).astype(jnp.float32),  # (1, 4H)
        )
    w, b = params["linear"]
    prepared["linear"] = (
        w.reshape(1, N_HIDDEN).astype(jnp.float32),                     # (1, H)
        b.reshape(1, 1).astype(jnp.float32),                            # (1, 1)
    )
    return prepared


# --------------------------------------------------------------------------
# Full forward pass == CovidPredictor.forward (after reset_hidden_state()).
# --------------------------------------------------------------------------
def covid_predictor_forward(sequences, prepared):
    n_seq = sequences.shape[0]
    # sequences.view(len(sequences), seq_len, -1): nn.LSTM default is time-major,
    # so T = n_seq, batch = SEQ_LENGTH. Flatten the (T, B) rows for lane-friendly tiles.
    x = jnp.asarray(sequences, jnp.float32).reshape(n_seq, SEQ_LENGTH, -1)
    T, B, F = x.shape
    H = N_HIDDEN
    x2d = x.reshape(T * B, F)

    arrays = [x2d]
    in_specs = [_full_spec(x2d.shape)]
    for l in range(N_LAYERS):
        for a in prepared[f"lstm_{l}"]:
            arrays.append(a)
            in_specs.append(_full_spec(a.shape))
    w_lin, b_lin = prepared["linear"]
    arrays += [w_lin, b_lin]
    in_specs += [_full_spec(w_lin.shape), _full_spec(b_lin.shape)]

    kernel = _make_kernel(T, B, H, n_seq, N_LAYERS)
    return pl.pallas_call(
        kernel,
        out_shape=jax.ShapeDtypeStruct((n_seq, 1), jnp.float32),
        in_specs=in_specs,
        out_specs=_full_spec((n_seq, 1)),
        scratch_shapes=[
            pltpu.VMEM((T * B, H), jnp.float32),       # h history / inter-layer activations
            pltpu.VMEM((T * B, 4 * H), jnp.float32),   # hoisted input-projection gates
        ],
    )(*arrays)


# --------------------------------------------------------------------------
# Pure-JAX reference (mirrors the PyTorch module, post reset_hidden_state()).
# --------------------------------------------------------------------------
def _reference_forward(sequences, raw_params):
    n_seq = sequences.shape[0]
    x = jnp.asarray(sequences, jnp.float32).reshape(n_seq, SEQ_LENGTH, -1)   # (T, B, F)
    T, B, _ = x.shape
    H = N_HIDDEN
    layer_in = x
    for l in range(N_LAYERS):
        w_ih, w_hh, b_ih, b_hh = raw_params[f"lstm_{l}"]
        h = jnp.zeros((B, H), jnp.float32)
        c = jnp.zeros((B, H), jnp.float32)
        outs = []
        for t in range(T):
            gates = layer_in[t] @ w_ih.T + b_ih + h @ w_hh.T + b_hh
            i = jax.nn.sigmoid(gates[:, :H])
            f = jax.nn.sigmoid(gates[:, H:2 * H])
            g = jnp.tanh(gates[:, 2 * H:3 * H])
            o = jax.nn.sigmoid(gates[:, 3 * H:])
            c = f * c + i * g
            h = o * jnp.tanh(c)
            outs.append(h)
        layer_in = jnp.stack(outs, axis=0)
    last = jnp.reshape(layer_in, (SEQ_LENGTH, n_seq, H))[-1]
    w, b = raw_params["linear"]
    return last @ w.T + b


if __name__ == "__main__":
    key = jax.random.PRNGKey(0)
    pkey, xkey = jax.random.split(key)
    raw_params = init_params(pkey)
    params = prepare_params(raw_params)   # one-time fold/transpose/permute (not per forward)

    batch = 2
    sequences = jax.random.normal(xkey, (batch, SEQ_LENGTH, N_FEATURES), jnp.float32)

    y_pred = covid_predictor_forward(sequences, params)
    jax.block_until_ready(y_pred)
    assert y_pred.shape == (batch, 1) and y_pred.dtype == jnp.float32

    y_ref = _reference_forward(sequences, raw_params)
    assert jnp.allclose(y_pred, y_ref, atol=1e-4, rtol=1e-4)

    print("KERNEL_OK")
</pallas_src>

<mosaic_0001>
module attributes {stable_mosaic.version = 11 : i64} {
  func.func @kernel(%arg0: memref<16x1xf32, #tpu.memory_space<vmem>>, %arg1: memref<1x128xf32, #tpu.memory_space<vmem>>, %arg2: memref<32x128xf32, #tpu.memory_space<vmem>>, %arg3: memref<1x128xf32, #tpu.memory_space<vmem>>, %arg4: memref<1x32xf32, #tpu.memory_space<vmem>>, %arg5: memref<1x1xf32, #tpu.memory_space<vmem>>, %arg6: memref<2x1xf32, #tpu.memory_space<vmem>>, %arg7: memref<16x32xf32, #tpu.memory_space<vmem>>, %arg8: memref<16x128xf32, #tpu.memory_space<vmem>>) attributes {dimension_semantics = [], scalar_prefetch = 0 : i64, scratch_operands = 2 : i64, tpu.core_type = #tpu.core_type<tc>} {
    %c0 = arith.constant 0 : index
    %c0_0 = arith.constant 0 : index
    %0 = vector.load %arg0[%c0, %c0_0] : memref<16x1xf32, #tpu.memory_space<vmem>>, vector<16x1xf32>
    %c0_1 = arith.constant 0 : index
    %c0_2 = arith.constant 0 : index
    %1 = vector.load %arg1[%c0_1, %c0_2] : memref<1x128xf32, #tpu.memory_space<vmem>>, vector<1x128xf32>
    %2 = vector.broadcast %0 : vector<16x1xf32> to vector<16x128xf32>
    %3 = vector.broadcast %1 : vector<1x128xf32> to vector<16x128xf32>
    %4 = arith.mulf %2, %3 : vector<16x128xf32>
    %c0_3 = arith.constant 0 : index
    %c0_4 = arith.constant 0 : index
    %5 = vector.load %arg3[%c0_3, %c0_4] : memref<1x128xf32, #tpu.memory_space<vmem>>, vector<1x128xf32>
    %6 = vector.broadcast %5 : vector<1x128xf32> to vector<16x128xf32>
    %7 = arith.addf %4, %6 : vector<16x128xf32>
    %c0_5 = arith.constant 0 : index
    %c0_6 = arith.constant 0 : index
    %8 = vector.load %arg8[%c0_5, %c0_6] : memref<16x128xf32, #tpu.memory_space<vmem>>, vector<16x128xf32>
    tpu.vector_store %arg8[%c0_5, %c0_6], %7 {strides = array<i32>} : memref<16x128xf32, #tpu.memory_space<vmem>>, vector<16x128xf32>,
    %c0_7 = arith.constant 0 : index
    %c0_8 = arith.constant 0 : index
    %9 = vector.load %arg2[%c0_7, %c0_8] : memref<32x128xf32, #tpu.memory_space<vmem>>, vector<32x128xf32>
    %cst = arith.constant 0.000000e+00 : f32
    %10 = vector.broadcast %cst : f32 to vector<8x32xf32>
    %cst_9 = arith.constant 0.000000e+00 : f32
    %11 = vector.broadcast %cst_9 : f32 to vector<8x32xf32>
    %c0_10 = arith.constant 0 : index
    %c0_11 = arith.constant 0 : index
    %12 = vector.load %arg8[%c0_10, %c0_11] : memref<16x128xf32, #tpu.memory_space<vmem>>, vector<8x128xf32>
    %cst_12 = arith.constant dense<0.000000e+00> : vector<8x128xf32>
    %13 = tpu.matmul %10, %9, %cst_12 {dimension_numbers = #tpu.dot_dimension_numbers<[1], [0], [0], [1], [0, 0, 1, 1], [], []>} : vector<8x32xf32>, vector<32x128xf32>, vector<8x128xf32> -> vector<8x128xf32>
    %14 = arith.addf %12, %13 : vector<8x128xf32>
    %15 = vector.extract_strided_slice %14 {offsets = [0, 0], sizes = [8, 96], strides = [1, 1]} : vector<8x128xf32> to vector<8x96xf32>
    %16 = arith.negf %15 : vector<8x96xf32>
    %17 = math.exp %16 : vector<8x96xf32>
    %cst_13 = arith.constant 1.000000e+00 : f32
    %18 = vector.broadcast %cst_13 : f32 to vector<8x96xf32>
    %19 = arith.addf %18, %17 : vector<8x96xf32>
    %20 = arith.divf %18, %19 : vector<8x96xf32>
    %21 = vector.extract_strided_slice %14 {offsets = [0, 96], sizes = [8, 32], strides = [1, 1]} : vector<8x128xf32> to vector<8x32xf32>
    %22 = math.tanh %21 : vector<8x32xf32>
    %23 = vector.extract_strided_slice %20 {offsets = [0, 32], sizes = [8, 32], strides = [1, 1]} : vector<8x96xf32> to vector<8x32xf32>
    %24 = arith.mulf %23, %11 : vector<8x32xf32>
    %25 = vector.extract_strided_slice %20 {offsets = [0, 0], sizes = [8, 32], strides = [1, 1]} : vector<8x96xf32> to vector<8x32xf32>
    %26 = arith.mulf %25, %22 : vector<8x32xf32>
    %27 = arith.addf %24, %26 : vector<8x32xf32>
    %28 = vector.extract_strided_slice %20 {offsets = [0, 64], sizes = [8, 32], strides = [1, 1]} : vector<8x96xf32> to vector<8x32xf32>
    %29 = math.tanh %27 : vector<8x32xf32>
    %30 = arith.mulf %28, %29 : vector<8x32xf32>
    %c0_14 = arith.constant 0 : index
    %c0_15 = arith.constant 0 : index
    %31 = vector.load %arg7[%c0_14, %c0_15] : memref<16x32xf32, #tpu.memory_space<vmem>>, vector<8x32xf32>
    tpu.vector_store %arg7[%c0_14, %c0_15], %30 {strides = array<i32>} : memref<16x32xf32, #tpu.memory_space<vmem>>, vector<8x32xf32>,
    %c8 = arith.constant 8 : index
    %c0_16 = arith.constant 0 : index
    %32 = vector.load %arg8[%c8, %c0_16] : memref<16x128xf32, #tpu.memory_space<vmem>>, vector<8x128xf32>
    %cst_17 = arith.constant dense<0.000000e+00> : vector<8x128xf32>
    %33 = tpu.matmul %30, %9, %cst_17 {dimension_numbers = #tpu.dot_dimension_numbers<[1], [0], [0], [1], [0, 0, 1, 1], [], []>} : vector<8x32xf32>, vector<32x128xf32>, vector<8x128xf32> -> vector<8x128xf32>
    %34 = arith.addf %32, %33 : vector<8x128xf32>
    %35 = vector.extract_strided_slice %34 {offsets = [0, 0], sizes = [8, 96], strides = [1, 1]} : vector<8x128xf32> to vector<8x96xf32>
    %36 = arith.negf %35 : vector<8x96xf32>
    %37 = math.exp %36 : vector<8x96xf32>
    %cst_18 = arith.constant 1.000000e+00 : f32
    %38 = vector.broadcast %cst_18 : f32 to vector<8x96xf32>
    %39 = arith.addf %38, %37 : vector<8x96xf32>
    %40 = arith.divf %38, %39 : vector<8x96xf32>
    %41 = vector.extract_strided_slice %34 {offsets = [0, 96], sizes = [8, 32], strides = [1, 1]} : vector<8x128xf32> to vector<8x32xf32>
    %42 = math.tanh %41 : vector<8x32xf32>
    %43 = vector.extract_strided_slice %40 {offsets = [0, 32], sizes = [8, 32], strides = [1, 1]} : vector<8x96xf32> to vector<8x32xf32>
    %44 = arith.mulf %43, %27 : vector<8x32xf32>
    %45 = vector.extract_strided_slice %40 {offsets = [0, 0], sizes = [8, 32], strides = [1, 1]} : vector<8x96xf32> to vector<8x32xf32>
    %46 = arith.mulf %45, %42 : vector<8x32xf32>
    %47 = arith.addf %44, %46 : vector<8x32xf32>
    %48 = vector.extract_strided_slice %40 {offsets = [0, 64], sizes = [8, 32], strides = [1, 1]} : vector<8x96xf32> to vector<8x32xf32>
    %49 = math.tanh %47 : vector<8x32xf32>
    %50 = arith.mulf %48, %49 : vector<8x32xf32>
    %c8_19 = arith.constant 8 : index
    %c0_20 = arith.constant 0 : index
    %51 = vector.load %arg7[%c8_19, %c0_20] : memref<16x32xf32, #tpu.memory_space<vmem>>, vector<8x32xf32>
    tpu.vector_store %arg7[%c8_19, %c0_20], %50 {strides = array<i32>} : memref<16x32xf32, #tpu.memory_space<vmem>>, vector<8x32xf32>,
    %c14 = arith.constant 14 : index
    %c0_21 = arith.constant 0 : index
    %52 = vector.load %arg7[%c14, %c0_21] : memref<16x32xf32, #tpu.memory_space<vmem>>, vector<2x32xf32>
    %c0_22 = arith.constant 0 : index
    %c0_23 = arith.constant 0 : index
    %53 = vector.load %arg4[%c0_22, %c0_23] : memref<1x32xf32, #tpu.memory_space<vmem>>, vector<1x32xf32>
    %54 = vector.broadcast %53 : vector<1x32xf32> to vector<2x32xf32>
    %55 = arith.mulf %52, %54 : vector<2x32xf32>
    %cst_24 = arith.constant dense<0.000000e+00> : vector<2xf32>
    %56 = vector.multi_reduction <add>, %55, %cst_24 [1] : vector<2x32xf32> to vector<2xf32>
    %57 = vector.shape_cast %56 : vector<2xf32> to vector<2x1xf32>
    %c0_25 = arith.constant 0 : index
    %c0_26 = arith.constant 0 : index
    %58 = vector.load %arg5[%c0_25, %c0_26] : memref<1x1xf32, #tpu.memory_space<vmem>>, vector<1x1xf32>
    %59 = vector.broadcast %58 : vector<1x1xf32> to vector<2x1xf32>
    %60 = arith.addf %57, %59 : vector<2x1xf32>
    %c0_27 = arith.constant 0 : index
    %c0_28 = arith.constant 0 : index
    %61 = vector.load %arg6[%c0_27, %c0_28] : memref<2x1xf32, #tpu.memory_space<vmem>>, vector<2x1xf32>
    tpu.vector_store %arg6[%c0_27, %c0_28], %60 {strides = array<i32>} : memref<2x1xf32, #tpu.memory_space<vmem>>, vector<2x1xf32>,
    return
  }
}

</mosaic_0001>

<bundles_post_ra>
// kernel: tpu_custom_call.1
= control target key start
LH: loop header
LB: loop body
LE: loop exit
PB: predicated region body
PF: predicated region fallthrough
CT: control target
= control target key end

     0   :  { %s361_s0 = inlined_call_operand.vmem [shape: f32[16,1], index: 0, kind: input, shape index: {}]   ;;  %s362_s1 = inlined_call_operand.vmem [shape: f32[1,128], index: 1, kind: input, shape index: {}]   ;;  %s363_s2 = inlined_call_operand.hbm [shape: f32[32,128], index: 2, kind: input, shape index: {}]   ;;  %s364_s3 = inlined_call_operand.vmem [shape: f32[1,128], index: 3, kind: input, shape index: {}]   ;;  %s365_s4 = inlined_call_operand.vmem [shape: f32[1,32], index: 4, kind: input, shape index: {}]   ;;  %s366_s5 = inlined_call_operand.<no memory space> [shape: f32[1,1], index: 5, kind: input, shape index: {}]   ;;  %s367_s6 = inlined_call_operand.vmem [shape: f32[2,1], index: 6, kind: output, shape index: {}]  }
   0x1   :  { %v11_v0 = vstv %s366_s5 }
   0x2   :  { %12 = vst [vmem:[#allocation4] sm:$0x1] %v11_v0 }
   0x3   :  { %13 = vsyncpa [#allocation6], 0  ;;  %s22_s25 = sshll.u32 %s363_s2, 4  ;;  %s285_s26 = smov [#allocation5]   ;;  %s23_s25 = int_to_ptr.hbm [resolvable:$true] %s22_s25 }
   0x4   :  { %s24_s27 = sshll.u32 %s285_s26, 4  ;;  %s286_s28 = smov 128   ;;  %s25_s27 = int_to_ptr.vmem [resolvable:$true] %s24_s27 }
   0x5   :  { %s287_s29 = smov 8  }
   0x6   :  { %30 = dma.hbm_to_vmem [thread:$0]  %s23_s25, 512, %s25_s27, [#allocation6], %s286_s28, %s286_s28, %s287_s29  }
   0x7   :  { %283 = dma.done.wait [#allocation6], 512  }
   0x8   :  { %284 = vsyncadd [#allocation6], 4294966784  ;;  %v288_v1 = vmov 0   ;;  %v70_v2 = vld [vmem:[#allocation5 + $0x18] sm:$0xff]  ;;  %v69_v3 = vld [vmem:[#allocation5 + $0x10] sm:$0xff]  ;;  %v289_v7 = vmov 0.0  }
   0x9   :  { %237 = vset.pattern.permute.xlu0 %v288_v1  ;;  %238 = vset.pattern.permute.xlu2 %v288_v1  ;;  %v41_v4 = vld [vmem:[%s361_s0] sm:$0xff]  ;;  %v67_v6 = vld [vmem:[#allocation5] sm:$0xff]  ;;  %s290_s10 = smov 32   ;;  %v42_v37 = vld [vmem:[%s361_s0 + $0x8] sm:$0xff]  ;;  %vm72_vm4 = vcmask 261120   ;;  %vm211_vm9 = vcmask 254976  }
   0xa   :  { %88 = vmatpush.msra.mxu0 %v70_v2  ;;  %154 = vmatpush.msra.mxu1 %v70_v2  ;;  %v68_v5 = vld [vmem:[#allocation5 + $0x8] sm:$0xff]  ;;  %vm220_vm10 = vcmask 1024  }
   0xb   :  { %46 = vperm.xlu0 %237, %v41_v4   ;;  %v239_v8 = vld [vmem:[%s362_s1] ss:$0 sm:$0xff]  ;;  %s291_s1 = smov 64  }
   0xc   :  { %89 = vmatpush.msra.mxu0 %v69_v3  ;;  %155 = vmatpush.msra.mxu1 %v69_v3  ;;  %v240_v11 = vld [vmem:[%s364_s3] ss:$0 sm:$0xff] }
   0xd   :  { %v241_v3 = vld [vmem:[%s365_s4] ss:$0 sm:$0xff] }
   0xe   :  { %90 = vmatpush.msra.mxu0 %v68_v5  ;;  %156 = vmatpush.msra.mxu1 %v68_v5 }
  0x10   :  { %91 = vmatpush.msra.mxu0 %v67_v6  ;;  %157 = vmatpush.msra.mxu1 %v67_v6 }
  0x11   :  { %92 = vmatmul.f32.vlgmr.msra.gmra.mxu0 %v289_v7  ;;  %v242_v7 = vld [vmem:[#allocation4] ss:$0 sm:$0xff] }
  0x7d   :  { %v47_v9 = vpop.permute.xlu0 %46 }
  0x7e   :  { %v57_v10 = vmul.f32 %v239_v8, %v47_v9 }
  0x80   :  { %v63_v12 = vadd.f32 %v240_v11, %v57_v10 }
  0x8e   :  { %v93_v13 = vpop.f32.mrf.mxu0 }
  0x8f   :  { %v96_v14 = vadd.f32 %v93_v13, %v63_v12 }
  0x91   :  { %243 = vtanh.f32 %v96_v14  ;;  %v227_v16 = vmul.f32 -1.442695, %v96_v14 }
  0x93   :  { %245 = vpow2.f32 %v227_v16 }
  0x97   :  { %v244_v15 = vpop.eup %243 }
  0x98   :  { %119 = vrot.lane.b32.xlu0 %v244_v15, %s290_s10 }
  0x99   :  { %v246_v17 = vpop.eup %245 }
  0x9a   :  { %v100_v18 = vadd.f32 1.0, %v246_v17 }
  0x9c   :  { %247 = vrcp.f32 %v100_v18  ;;  %v112_v24 = vand.u32 2147483648, %v100_v18  ;;  %vm106_vm1 = vweird.f32 %v100_v18  ;;  %v110_v25 = vand.u32 2147483647, %v100_v18 }
  0x9e   :  { %v113_v27 = vor.u32 1.1754944e-38, %v112_v24  ;;  %vm111_vm3 = vcmp.eq.f32.partialorder %v110_v25, 8.507059e+37 }
  0xa2   :  { %v248_v19 = vpop.eup %247 }
  0xa3   :  { %v102_v20 = vmul.f32 %v248_v19, %v100_v18  ;;  %vm107_vm0 = vweird.f32 %v248_v19 }
  0xa4   :  { %vm108_vm2 = vmor %vm106_vm1, %vm107_vm0 }
  0xa5   :  { %v103_v21 = vsub.f32 1.0, %v102_v20 }
  0xa7   :  { %v104_v22 = vmul.f32 %v248_v19, %v103_v21 }
  0xa9   :  { %v105_v23 = vadd.f32 %v248_v19, %v104_v22 }
  0xab   :  { %v109_v26 = vsel %vm108_vm2, %v248_v19, %v105_v23 }
  0xac   :  { %v114_v29 = vsel %vm111_vm3, %v113_v27, %v109_v26 }
  0xad   :  { %v117_v31 = vmul.f32 0.0, %v114_v29 }
 0x10a   :  { %v120_v28 = vpop.permute.xlu0 %119 }
 0x10b   :  { %v122_v30 = vmul.f32 %v120_v28, %v114_v29 }
 0x10d   :  { %124 = vrot.lane.b32.xlu1 %v122_v30, %s290_s10 }
 0x17f   :  { %v125_v32 = vpop.permute.xlu1 %124 }
 0x180   :  { %v127_v33 = vadd.f32 %v125_v32, %v117_v31 }
 0x182   :  { %249 = vtanh.f32 %v127_v33 }
 0x188   :  { %v250_v34 = vpop.eup %249 }
 0x189   :  { %130 = vrot.lane.b32.xlu1 %v250_v34, %s290_s10 }
 0x1fb   :  { %v131_v35 = vpop.permute.xlu1 %130 }
 0x1fc   :  { %v133_v36 = vmul.f32 %v131_v35, %v114_v29 }
 0x1fe   :  { %135 = vrot.lane.b32.xlu2 %v133_v36, %s291_s1 }
 0x206   :  { %51 = vperm.xlu2 %238, %v42_v37  }
 0x258   :  { %v136_v38 = vpop.permute.xlu2 %135 }
 0x259   :  { %228 = vmatmul.msk.f32.vlgmr.msra.gmra.mxu1 %vm72_vm4, %v136_v38 }
 0x260   :  { %v52_v39 = vpop.permute.xlu2 %51 }
 0x261   :  { %v58_v40 = vmul.f32 %v239_v8, %v52_v39 }
 0x263   :  { %v64_v41 = vadd.f32 %v240_v11, %v58_v40 }
 0x2d6   :  { %v159_v42 = vpop.f32.mrf.mxu1 }
 0x2d7   :  { %v162_v43 = vadd.f32 %v159_v42, %v64_v41 }
 0x2d9   :  { %251 = vtanh.f32 %v162_v43  ;;  %v229_v45 = vmul.f32 -1.442695, %v162_v43 }
 0x2db   :  { %253 = vpow2.f32 %v229_v45 }
 0x2df   :  { %v252_v44 = vpop.eup %251 }
 0x2e0   :  { %185 = vrot.lane.b32.xlu0 %v252_v44, %s290_s10 }
 0x2e1   :  { %v254_v46 = vpop.eup %253 }
 0x2e2   :  { %v166_v47 = vadd.f32 1.0, %v254_v46 }
 0x2e4   :  { %255 = vrcp.f32 %v166_v47  ;;  %v178_v53 = vand.u32 2147483648, %v166_v47  ;;  %vm172_vm6 = vweird.f32 %v166_v47  ;;  %v176_v54 = vand.u32 2147483647, %v166_v47 }
 0x2e6   :  { %v179_v56 = vor.u32 1.1754944e-38, %v178_v53  ;;  %vm177_vm8 = vcmp.eq.f32.partialorder %v176_v54, 8.507059e+37 }
 0x2ea   :  { %v256_v48 = vpop.eup %255 }
 0x2eb   :  { %v168_v49 = vmul.f32 %v256_v48, %v166_v47  ;;  %vm173_vm5 = vweird.f32 %v256_v48 }
 0x2ec   :  { %vm174_vm7 = vmor %vm172_vm6, %vm173_vm5 }
 0x2ed   :  { %v169_v50 = vsub.f32 1.0, %v168_v49 }
 0x2ef   :  { %v170_v51 = vmul.f32 %v256_v48, %v169_v50 }
 0x2f1   :  { %v171_v52 = vadd.f32 %v256_v48, %v170_v51 }
 0x2f3   :  { %v175_v55 = vsel %vm174_vm7, %v256_v48, %v171_v52 }
 0x2f4   :  { %v180_v58 = vsel %vm177_vm8, %v179_v56, %v175_v55 }
 0x2f5   :  { %v183_v60 = vmul.f32 %v180_v58, %v127_v33 }
 0x352   :  { %v186_v57 = vpop.permute.xlu0 %185 }
 0x353   :  { %v188_v59 = vmul.f32 %v186_v57, %v180_v58 }
 0x355   :  { %190 = vrot.lane.b32.xlu1 %v188_v59, %s290_s10 }
 0x3c7   :  { %v191_v61 = vpop.permute.xlu1 %190 }
 0x3c8   :  { %v193_v62 = vadd.f32 %v191_v61, %v183_v60 }
 0x3ca   :  { %257 = vtanh.f32 %v193_v62 }
 0x3d0   :  { %v258_v63 = vpop.eup %257 }
 0x3d1   :  { %196 = vrot.lane.b32.xlu2 %v258_v63, %s290_s10 }
 0x42b   :  { %v197_v0 = vpop.permute.xlu2 %196 }
 0x42c   :  { %v199_v1 = vmul.f32 %v197_v0, %v180_v58 }
 0x42e   :  { %201 = vrot.lane.b32.xlu0 %v199_v1, %s291_s1 }
 0x4a0   :  { %v202_v2 = vpop.permute.xlu0 %201 }
 0x4a1   :  { %204 = vst.msk [vmem:[#allocation2 + $0x8] sm:$0xff] %vm72_vm4, %v202_v2 }
 0x4a8   :  { %v205_v4 = vld [vmem:[#allocation2 + $0xe] sm:$0x3] }
 0x4a9   :  { %v210_v5 = vmul.f32 %v241_v3, %v205_v4 }
 0x4ab   :  { %v212_v6 = vsel %vm211_vm9, %v210_v5, 0.0 }
 0x4ac   :  { %213 = vadd.xlane.f32.xlu1 %v212_v6 }
 0x51f   :  { %v214_v8 = vpop.xlane.xlu1 %213 }
 0x520   :  { %v219_v9 = vadd.f32 %v242_v7, %v214_v8 }
 0x522   :  { %221 = vst.msk [vmem:[%s367_s6] sm:$0x3] %vm220_vm10, %v219_v9 }
 0x523   :  { %226 = vsyncpa [#allocation6], 1 }

</bundles_post_ra>
